<compile_context>
chip_gen: v7x
topology: tpu7x:2x2x1
jax: 0.10.0
libtpu: 0.0.40
codegen_flags: <defaults>
</compile_context>

<pallas_src>
from functools import partial

import jax
import jax.numpy as jnp
from jax.experimental import pallas as pl
from jax.experimental.pallas import tpu as pltpu

LANE = 128
SUBLANE = 8


def _round_up(x, m):
    return (x + m - 1) // m * m


def gcn_fused_kernel(adj_ref, x_ref, w1_ref, b1_ref, w2_ref, b2_ref, out_ref,
                     *, matmul_dtype):
    """Fused 2-layer GCN forward; everything resident in VMEM."""
    adj = adj_ref[...].astype(matmul_dtype)

    # ---- Layer 1: H = relu(A_hat @ (X @ W1) + b1) ----
    xw1 = jnp.dot(x_ref[...].astype(matmul_dtype),
                  w1_ref[...].astype(matmul_dtype),
                  preferred_element_type=jnp.float32)
    h = jnp.dot(adj, xw1.astype(matmul_dtype),
                preferred_element_type=jnp.float32)
    h = jnp.maximum(h + b1_ref[...], 0.0)           # bias + ReLU epilogue in f32

    # F.dropout(p=0.5, training=False) -> identity in eval mode.
    # TODO(synk): training-mode dropout would use pltpu.prng_seed/prng_random_bits.

    # ---- Layer 2: out = A_hat @ (H @ W2) + b2 ----
    hw2 = jnp.dot(h.astype(matmul_dtype),
                  w2_ref[...].astype(matmul_dtype),
                  preferred_element_type=jnp.float32)
    out = jnp.dot(adj, hw2.astype(matmul_dtype),
                  preferred_element_type=jnp.float32)
    out_ref[...] = (out + b2_ref[...]).astype(out_ref.dtype)


def gcn_forward(x, adj, w1, b1, w2, b2, *, matmul_dtype=jnp.float32):
    """Two-layer GCN forward. Pads to lane-dense shapes, runs one fused kernel."""
    N, F_in = x.shape
    hidden = w1.shape[1]
    n_classes = w2.shape[1]

    # Pad node count to a sublane multiple and all feature dims to full
    # 128-lane multiples (zero padding is exact: padded columns stay zero
    # through both layers, padded rows are sliced off at the end).
    n_pad = _round_up(N, SUBLANE)
    f_in_pad = _round_up(F_in, LANE)
    hid_pad = _round_up(hidden, LANE)
    cls_pad = _round_up(n_classes, LANE)

    adj_p = jnp.pad(adj, ((0, n_pad - N), (0, n_pad - N)))
    x_p = jnp.pad(x, ((0, n_pad - N), (0, f_in_pad - F_in)))
    w1_p = jnp.pad(w1, ((0, f_in_pad - F_in), (0, hid_pad - hidden)))
    b1_p = jnp.pad(b1, ((0, 0), (0, hid_pad - hidden)))
    w2_p = jnp.pad(w2, ((0, hid_pad - hidden), (0, cls_pad - n_classes)))
    b2_p = jnp.pad(b2, ((0, 0), (0, cls_pad - n_classes)))

    kernel = partial(gcn_fused_kernel, matmul_dtype=matmul_dtype)
    vmem_full = pl.BlockSpec(memory_space=pltpu.MemorySpace.VMEM)
    out_p = pl.pallas_call(
        kernel,
        out_shape=jax.ShapeDtypeStruct((n_pad, cls_pad), x.dtype),
        # No grid: single invocation, full arrays auto-DMA'd into VMEM.
        in_specs=[vmem_full] * 6,
        out_specs=vmem_full,
    )(adj_p, x_p, w1_p, b1_p, w2_p, b2_p)
    return out_p[:N, :n_classes]


def build_norm_adj(edge_index, num_nodes):
    """Dense symmetric-normalized adjacency, PyG gcn_norm semantics.

    A_hat[dst, src] = deg^{-1/2}[dst] * deg^{-1/2}[src], with self-loops added
    only where missing (add_remaining_self_loops).  Plain-JAX glue; the matmul
    hot path is in the Pallas kernel.
    """
    src, dst = edge_index[0], edge_index[1]
    A = jnp.zeros((num_nodes, num_nodes), jnp.float32)
    A = A.at[dst, src].add(1.0)
    diag = jnp.diagonal(A)
    A = A + jnp.diag(jnp.where(diag == 0.0, 1.0, 0.0))  # only fill missing self-loops
    deg = A.sum(axis=1)
    dinv = jnp.where(deg > 0, jax.lax.rsqrt(deg), 0.0)
    return dinv[:, None] * A * dinv[None, :]


def glorot(key, shape):
    limit = jnp.sqrt(6.0 / (shape[0] + shape[1]))
    return jax.random.uniform(key, shape, jnp.float32, -limit, limit)


if __name__ == "__main__":
    N, F_IN, HIDDEN, N_CLASSES, E = 128, 32, 16, 8, 512

    key = jax.random.PRNGKey(0)
    kx, ke, kw1, kw2 = jax.random.split(key, 4)

    x = jax.random.normal(kx, (N, F_IN), jnp.float32)
    edge_index = jax.random.randint(ke, (2, E), 0, N, dtype=jnp.int32)

    # Synthetic GCNConv parameters (weight [F_in, F_out], bias [F_out]).
    w1 = glorot(kw1, (F_IN, HIDDEN))
    b1 = jnp.zeros((1, HIDDEN), jnp.float32)
    w2 = glorot(kw2, (HIDDEN, N_CLASSES))
    b2 = jnp.zeros((1, N_CLASSES), jnp.float32)

    adj = build_norm_adj(edge_index, N)

    out = gcn_forward(x, adj, w1, b1, w2, b2)
    out = jax.block_until_ready(out)
    assert out.shape == (N, N_CLASSES) and out.dtype == jnp.float32

    # Plain-JAX reference (same math) as a sanity check.
    hp = jax.lax.Precision.HIGHEST
    h_ref = jnp.maximum(
        jnp.dot(adj, jnp.dot(x, w1, precision=hp), precision=hp) + b1, 0.0)
    out_ref = jnp.dot(adj, jnp.dot(h_ref, w2, precision=hp), precision=hp) + b2
    assert jnp.allclose(out, out_ref, atol=1e-2, rtol=1e-2)

    print("KERNEL_OK")
</pallas_src>

<mosaic_0001>
module attributes {stable_mosaic.version = 11 : i64} {
  func.func @gcn_fused_kernel(%arg0: memref<128x128xf32, #tpu.memory_space<vmem>>, %arg1: memref<128x128xf32, #tpu.memory_space<vmem>>, %arg2: memref<128x128xf32, #tpu.memory_space<vmem>>, %arg3: memref<1x128xf32, #tpu.memory_space<vmem>>, %arg4: memref<128x128xf32, #tpu.memory_space<vmem>>, %arg5: memref<1x128xf32, #tpu.memory_space<vmem>>, %arg6: memref<128x128xf32, #tpu.memory_space<vmem>>) attributes {dimension_semantics = [], scalar_prefetch = 0 : i64, scratch_operands = 0 : i64, tpu.core_type = #tpu.core_type<tc>} {
    %c0 = arith.constant 0 : index
    %c0_0 = arith.constant 0 : index
    %0 = vector.load %arg0[%c0, %c0_0] : memref<128x128xf32, #tpu.memory_space<vmem>>, vector<128x128xf32>
    %c0_1 = arith.constant 0 : index
    %c0_2 = arith.constant 0 : index
    %1 = vector.load %arg1[%c0_1, %c0_2] : memref<128x128xf32, #tpu.memory_space<vmem>>, vector<128x128xf32>
    %c0_3 = arith.constant 0 : index
    %c0_4 = arith.constant 0 : index
    %2 = vector.load %arg2[%c0_3, %c0_4] : memref<128x128xf32, #tpu.memory_space<vmem>>, vector<128x128xf32>
    %cst = arith.constant dense<0.000000e+00> : vector<128x128xf32>
    %3 = tpu.matmul %1, %2, %cst {dimension_numbers = #tpu.dot_dimension_numbers<[1], [0], [0], [1], [0, 0, 1, 1], [], []>} : vector<128x128xf32>, vector<128x128xf32>, vector<128x128xf32> -> vector<128x128xf32>
    %cst_5 = arith.constant dense<0.000000e+00> : vector<128x128xf32>
    %4 = tpu.matmul %0, %3, %cst_5 {dimension_numbers = #tpu.dot_dimension_numbers<[1], [0], [0], [1], [0, 0, 1, 1], [], []>} : vector<128x128xf32>, vector<128x128xf32>, vector<128x128xf32> -> vector<128x128xf32>
    %c0_6 = arith.constant 0 : index
    %c0_7 = arith.constant 0 : index
    %5 = vector.load %arg3[%c0_6, %c0_7] : memref<1x128xf32, #tpu.memory_space<vmem>>, vector<1x128xf32>
    %6 = vector.broadcast %5 : vector<1x128xf32> to vector<128x128xf32>
    %7 = arith.addf %4, %6 : vector<128x128xf32>
    %cst_8 = arith.constant 0.000000e+00 : f32
    %8 = vector.broadcast %cst_8 : f32 to vector<128x128xf32>
    %9 = arith.maximumf %7, %8 : vector<128x128xf32>
    %c0_9 = arith.constant 0 : index
    %c0_10 = arith.constant 0 : index
    %10 = vector.load %arg4[%c0_9, %c0_10] : memref<128x128xf32, #tpu.memory_space<vmem>>, vector<128x128xf32>
    %cst_11 = arith.constant dense<0.000000e+00> : vector<128x128xf32>
    %11 = tpu.matmul %9, %10, %cst_11 {dimension_numbers = #tpu.dot_dimension_numbers<[1], [0], [0], [1], [0, 0, 1, 1], [], []>} : vector<128x128xf32>, vector<128x128xf32>, vector<128x128xf32> -> vector<128x128xf32>
    %cst_12 = arith.constant dense<0.000000e+00> : vector<128x128xf32>
    %12 = tpu.matmul %0, %11, %cst_12 {dimension_numbers = #tpu.dot_dimension_numbers<[1], [0], [0], [1], [0, 0, 1, 1], [], []>} : vector<128x128xf32>, vector<128x128xf32>, vector<128x128xf32> -> vector<128x128xf32>
    %c0_13 = arith.constant 0 : index
    %c0_14 = arith.constant 0 : index
    %13 = vector.load %arg5[%c0_13, %c0_14] : memref<1x128xf32, #tpu.memory_space<vmem>>, vector<1x128xf32>
    %14 = vector.broadcast %13 : vector<1x128xf32> to vector<128x128xf32>
    %15 = arith.addf %12, %14 : vector<128x128xf32>
    %c0_15 = arith.constant 0 : index
    %c0_16 = arith.constant 0 : index
    %16 = vector.load %arg6[%c0_15, %c0_16] : memref<128x128xf32, #tpu.memory_space<vmem>>, vector<128x128xf32>
    tpu.vector_store %arg6[%c0_15, %c0_16], %15 {strides = array<i32>} : memref<128x128xf32, #tpu.memory_space<vmem>>, vector<128x128xf32>,
    return
  }
}

</mosaic_0001>

<bundles_post_ra>
// kernel: tpu_custom_call.1
= control target key start
LH: loop header
LB: loop body
LE: loop exit
PB: predicated region body
PF: predicated region fallthrough
CT: control target
= control target key end

     0   :  { %11 = vsyncpa [#allocation3], 0  ;;  %s1596_s0 = inlined_call_operand.hbm [shape: f32[128,128], index: 0, kind: input, shape index: {}]   ;;  %s1597_s1 = inlined_call_operand.hbm [shape: f32[128,128], index: 1, kind: input, shape index: {}]   ;;  %s1598_s2 = inlined_call_operand.hbm [shape: f32[128,128], index: 2, kind: input, shape index: {}]   ;;  %s1599_s3 = inlined_call_operand.vmem [shape: f32[1,128], index: 3, kind: input, shape index: {}]   ;;  %s1600_s4 = inlined_call_operand.hbm [shape: f32[128,128], index: 4, kind: input, shape index: {}]   ;;  %s1601_s5 = inlined_call_operand.vmem [shape: f32[1,128], index: 5, kind: input, shape index: {}]   ;;  %s1602_s6 = inlined_call_operand.hbm [shape: f32[128,128], index: 6, kind: output, shape index: {}]  }
   0x1   :  { %12 = vsyncpa [#allocation6], 0 }
   0x2   :  { %13 = vsyncpa [#allocation9], 0 }
   0x3   :  { %14 = vsyncpa [#allocation4], 0  ;;  %s1395_s21 = smov [#allocation5]   ;;  %s1396_s23 = smov [#allocation2]  }
   0x4   :  { %s32_s22 = sshll.u32 %s1395_s21, 4  ;;  %s20_s24 = sshll.u32 %s1396_s23, 4  ;;  %s33_s22 = int_to_ptr.vmem [resolvable:$true] %s32_s22  ;;  %s1437_s24 = int_to_ptr.vmem [resolvable:$true] %s20_s24 }
   0x5   :  { %s1277_s27 = scalar_lea.hbm %s1597_s1, 2048 }
   0x6   :  { %p1278_p0 = scmp.ne.s32.totalorder %s1597_s1, %s1277_s27  ;;  %p1281_p1 = scmp.lt.u32.totalorder %s1277_s27, %s1597_s1 }
   0x8   :  { %p1283_p2 = pnand %p1281_p1, %p1278_p0 }
   0xa   :  { %1286 = shalt.err (!%p1283_p2)
}
   0xb   :  { %s1287_s8 = scalar_lea.vmem %s33_s22, 2048  ;;  %p1292_p4 = scmp.lt.s32.totalorder %s33_s22, %s33_s22 }
   0xc   :  { %p1288_p3 = scmp.ne.s32.totalorder %s33_s22, %s1287_s8  ;;  %p1293_p5 = scmp.lt.s32.totalorder %s1287_s8, %s1287_s8 }
   0xe   :  { %p1294_p6 = por %p1293_p5, %p1292_p4 }
  0x10   :  { %p1295_p7 = pnand %p1294_p6, %p1288_p3 }
  0x12   :  { %1298 = shalt.err (!%p1295_p7)
}
  0x13   :  { %s1397_s9 = smov 128   ;;  %s1398_s10 = smov 8  }
  0x14   :  { %38 = dma.hbm_to_vmem [thread:$0]  %s1597_s1, 2048, %s33_s22, [#allocation6], %s1397_s9, %s1397_s9, %s1398_s10  }
  0x15   :  { %s1299_s15 = scalar_lea.hbm %s1596_s0, 2048 }
  0x16   :  { %p1300_p8 = scmp.ne.s32.totalorder %s1596_s0, %s1299_s15  ;;  %p1303_p9 = scmp.lt.u32.totalorder %s1299_s15, %s1596_s0 }
  0x18   :  { %p1305_p10 = pnand %p1303_p9, %p1300_p8 }
  0x1a   :  { %1308 = shalt.err (!%p1305_p10)
}
  0x1b   :  { %s1309_s20 = scalar_lea.vmem %s1437_s24, 2048  ;;  %p1314_p12 = scmp.lt.s32.totalorder %s1437_s24, %s1437_s24 }
  0x1c   :  { %p1310_p11 = scmp.ne.s32.totalorder %s1437_s24, %s1309_s20  ;;  %p1315_p13 = scmp.lt.s32.totalorder %s1309_s20, %s1309_s20 }
  0x1e   :  { %p1316_p0 = por %p1315_p13, %p1314_p12 }
  0x20   :  { %p1317_p1 = pnand %p1316_p0, %p1310_p11 }
  0x22   :  { %1320 = shalt.err (!%p1317_p1)
}
  0x23   :  { %26 = dma.hbm_to_vmem [thread:$0]  %s1596_s0, 2048, %s1437_s24, [#allocation3], %s1397_s9, %s1397_s9, %s1398_s10  }
  0x24   :  { %s1399_s22 = smov [#allocation7]   ;;  %s1400_s25 = smov [#allocation8]  }
  0x25   :  { %s44_s23 = sshll.u32 %s1399_s22, 4  ;;  %s58_s26 = sshll.u32 %s1400_s25, 4  ;;  %s45_s23 = int_to_ptr.vmem [resolvable:$true] %s44_s23  ;;  %s1474_s26 = int_to_ptr.vmem [resolvable:$true] %s58_s26 }
  0x26   :  { %s1321_s29 = scalar_lea.hbm %s1598_s2, 2048 }
  0x27   :  { %p1322_p2 = scmp.ne.s32.totalorder %s1598_s2, %s1321_s29  ;;  %p1325_p3 = scmp.lt.u32.totalorder %s1321_s29, %s1598_s2 }
  0x29   :  { %p1327_p4 = pnand %p1325_p3, %p1322_p2 }
  0x2b   :  { %1330 = shalt.err (!%p1327_p4)
}
  0x2c   :  { %s1331_s0 = scalar_lea.vmem %s45_s23, 2048  ;;  %p1336_p6 = scmp.lt.s32.totalorder %s45_s23, %s45_s23 }
  0x2d   :  { %p1332_p5 = scmp.ne.s32.totalorder %s45_s23, %s1331_s0  ;;  %p1337_p7 = scmp.lt.s32.totalorder %s1331_s0, %s1331_s0 }
  0x2f   :  { %p1338_p8 = por %p1337_p7, %p1336_p6 }
  0x31   :  { %p1339_p9 = pnand %p1338_p8, %p1332_p5 }
  0x33   :  { %1342 = shalt.err (!%p1339_p9)
}
  0x34   :  { %50 = dma.hbm_to_vmem [thread:$0]  %s1598_s2, 2048, %s45_s23, [#allocation6], %s1397_s9, %s1397_s9, %s1398_s10  }
  0x35   :  { %s1343_s15 = scalar_lea.hbm %s1600_s4, 2048 }
  0x36   :  { %p1344_p10 = scmp.ne.s32.totalorder %s1600_s4, %s1343_s15  ;;  %p1347_p11 = scmp.lt.u32.totalorder %s1343_s15, %s1600_s4 }
  0x38   :  { %p1349_p12 = pnand %p1347_p11, %p1344_p10 }
  0x3a   :  { %1352 = shalt.err (!%p1349_p12)
}
  0x3b   :  { %s1353_s20 = scalar_lea.vmem %s1474_s26, 2048  ;;  %p1358_p0 = scmp.lt.s32.totalorder %s1474_s26, %s1474_s26 }
  0x3c   :  { %p1354_p13 = scmp.ne.s32.totalorder %s1474_s26, %s1353_s20  ;;  %p1359_p1 = scmp.lt.s32.totalorder %s1353_s20, %s1353_s20 }
  0x3e   :  { %p1360_p2 = por %p1359_p1, %p1358_p0 }
  0x40   :  { %p1361_p3 = pnand %p1360_p2, %p1354_p13 }
  0x42   :  { %1364 = shalt.err (!%p1361_p3)
}
  0x43   :  { %64 = dma.hbm_to_vmem [thread:$0]  %s1600_s4, 2048, %s1474_s26, [#allocation9], %s1397_s9, %s1397_s9, %s1398_s10  }
  0x44   :  { %1387 = dma.done.wait [#allocation3], 2048  }
  0x45   :  { %1388 = vsyncadd [#allocation3], 4294965248 }
  0x46   :  { %1389 = dma.done.wait [#allocation6], 4096  }
  0x47   :  { %1390 = vsyncadd [#allocation6], 4294963200 }
  0x48   :  { %1391 = dma.done.wait [#allocation9], 2048  }
  0x49   :  { %1392 = vsyncadd [#allocation9], 4294965248  ;;  %v111_v0 = vld [vmem:[#allocation7] sm:$0xff]  ;;  %v112_v1 = vld [vmem:[#allocation7 + $0x8] sm:$0xff] }
  0x4a   :  { %v113_v2 = vld [vmem:[#allocation7 + $0x10] sm:$0xff]  ;;  %v1142_v3 = vpack.c.bf16 %v112_v1, %v111_v0  ;;  %v114_v4 = vld [vmem:[#allocation7 + $0x18] sm:$0xff]  ;;  %v115_v6 = vld [vmem:[#allocation7 + $0x20] sm:$0xff] }
  0x4b   :  { %v1146_v5 = vpack.c.bf16 %v114_v4, %v113_v2  ;;  %v116_v7 = vld [vmem:[#allocation7 + $0x28] sm:$0xff]  ;;  %v95_v9 = vld [vmem:[#allocation5] sm:$0xff]  ;;  %v117_v10 = vld [vmem:[#allocation7 + $0x30] sm:$0xff] }
  0x4c   :  { %1143 = vmatprep.subr.bf16.mxu0 %v1142_v3  ;;  %v1150_v8 = vpack.c.bf16 %v116_v7, %v115_v6  ;;  %v118_v11 = vld [vmem:[#allocation7 + $0x38] sm:$0xff]  ;;  %950 = vmatprep.mubr.f32.mxu0 %v95_v9  ;;  %v119_v13 = vld [vmem:[#allocation7 + $0x40] sm:$0xff]  ;;  %v120_v14 = vld [vmem:[#allocation7 + $0x48] sm:$0xff] }
  0x4d   :  { %1145 = vmatpush3.bf16.msra.mxu0 %v1142_v3  ;;  %v1154_v12 = vpack.c.bf16 %v118_v11, %v117_v10  ;;  %v1158_v15 = vpack.c.bf16 %v120_v14, %v119_v13  ;;  %v121_v16 = vld [vmem:[#allocation7 + $0x50] sm:$0xff]  ;;  %v122_v17 = vld [vmem:[#allocation7 + $0x58] sm:$0xff]  ;;  %v123_v19 = vld [vmem:[#allocation7 + $0x60] sm:$0xff] }
  0x4e   :  { %1147 = vmatprep.subr.bf16.mxu0 %v1146_v5  ;;  %v1162_v18 = vpack.c.bf16 %v122_v17, %v121_v16  ;;  %v124_v20 = vld [vmem:[#allocation7 + $0x68] sm:$0xff]  ;;  %v125_v22 = vld [vmem:[#allocation7 + $0x70] sm:$0xff]  ;;  %v126_v23 = vld [vmem:[#allocation7 + $0x78] sm:$0xff] }
  0x4f   :  { %v1166_v21 = vpack.c.bf16 %v124_v20, %v123_v19  ;;  %v1170_v24 = vpack.c.bf16 %v126_v23, %v125_v22  ;;  %v96_v25 = vld [vmem:[#allocation5 + $0x8] sm:$0xff]  ;;  %v97_v26 = vld [vmem:[#allocation5 + $0x10] sm:$0xff]  ;;  %v98_v27 = vld [vmem:[#allocation5 + $0x18] sm:$0xff] }
  0x50   :  { %v99_v28 = vld [vmem:[#allocation5 + $0x20] sm:$0xff]  ;;  %v100_v29 = vld [vmem:[#allocation5 + $0x28] sm:$0xff]  ;;  %v101_v30 = vld [vmem:[#allocation5 + $0x30] sm:$0xff] }
  0x51   :  { %1149 = vmatpush3.bf16.msra.mxu0 %v1146_v5  ;;  %v102_v31 = vld [vmem:[#allocation5 + $0x38] sm:$0xff]  ;;  %v103_v32 = vld [vmem:[#allocation5 + $0x40] sm:$0xff]  ;;  %v104_v33 = vld [vmem:[#allocation5 + $0x48] sm:$0xff] }
  0x52   :  { %1151 = vmatprep.subr.bf16.mxu0 %v1150_v8  ;;  %v105_v34 = vld [vmem:[#allocation5 + $0x50] sm:$0xff]  ;;  %v106_v35 = vld [vmem:[#allocation5 + $0x58] sm:$0xff]  ;;  %v107_v36 = vld [vmem:[#allocation5 + $0x60] sm:$0xff] }
  0x53   :  { %v108_v37 = vld [vmem:[#allocation5 + $0x68] sm:$0xff]  ;;  %v109_v38 = vld [vmem:[#allocation5 + $0x70] sm:$0xff]  ;;  %v110_v39 = vld [vmem:[#allocation5 + $0x78] sm:$0xff] }
  0x54   :  { %v1511_v40 = vld [vmem:[#allocation2] sm:$0xff]  ;;  %v441_v42 = vld [vmem:[#allocation8 + $0x8] sm:$0xff]  ;;  %v442_v43 = vld [vmem:[#allocation8 + $0x10] sm:$0xff] }
  0x55   :  { %1153 = vmatpush3.bf16.msra.mxu0 %v1150_v8  ;;  %1006 = vmatprep.mubr.f32.mxu1 %v1511_v40  ;;  %v440_v41 = vld [vmem:[#allocation8] sm:$0xff]  ;;  %v443_v45 = vld [vmem:[#allocation8 + $0x18] sm:$0xff]  ;;  %v445_v48 = vld [vmem:[#allocation8 + $0x28] sm:$0xff] }
  0x56   :  { %1155 = vmatprep.subr.bf16.mxu0 %v1154_v12  ;;  %v1206_v44 = vpack.c.bf16 %v441_v42, %v440_v41  ;;  %v1210_v46 = vpack.c.bf16 %v443_v45, %v442_v43  ;;  %v444_v47 = vld [vmem:[#allocation8 + $0x20] sm:$0xff]  ;;  %v446_v50 = vld [vmem:[#allocation8 + $0x30] sm:$0xff]  ;;  %v447_v51 = vld [vmem:[#allocation8 + $0x38] sm:$0xff] }
  0x57   :  { %v1214_v49 = vpack.c.bf16 %v445_v48, %v444_v47  ;;  %v1218_v52 = vpack.c.bf16 %v447_v51, %v446_v50  ;;  %v448_v53 = vld [vmem:[#allocation8 + $0x40] sm:$0xff]  ;;  %v449_v54 = vld [vmem:[#allocation8 + $0x48] sm:$0xff]  ;;  %v450_v56 = vld [vmem:[#allocation8 + $0x50] sm:$0xff] }
  0x58   :  { %v1222_v55 = vpack.c.bf16 %v449_v54, %v448_v53  ;;  %v451_v57 = vld [vmem:[#allocation8 + $0x58] sm:$0xff]  ;;  %v452_v59 = vld [vmem:[#allocation8 + $0x60] sm:$0xff]  ;;  %v453_v60 = vld [vmem:[#allocation8 + $0x68] sm:$0xff] }
  0x59   :  { %1157 = vmatpush3.bf16.msra.mxu0 %v1154_v12  ;;  %v1226_v58 = vpack.c.bf16 %v451_v57, %v450_v56  ;;  %v1230_v61 = vpack.c.bf16 %v453_v60, %v452_v59  ;;  %v1514_v22 = vld [vmem:[#allocation2 + $0x8] sm:$0xff]  ;;  %v1516_v23 = vld [vmem:[#allocation2 + $0x10] sm:$0xff]  ;;  %v788_v41 = vld [vmem:[%s1599_s3] ss:$0 sm:$0xff] }
  0x5a   :  { %1159 = vmatprep.subr.bf16.mxu0 %v1158_v15 }
  0x5d   :  { %1161 = vmatpush3.bf16.msra.mxu0 %v1158_v15 }
  0x5e   :  { %1163 = vmatprep.subr.bf16.mxu0 %v1162_v18 }
  0x61   :  { %1165 = vmatpush3.bf16.msra.mxu0 %v1162_v18 }
  0x62   :  { %1167 = vmatprep.subr.bf16.mxu0 %v1166_v21 }
  0x65   :  { %1169 = vmatpush3.bf16.msra.mxu0 %v1166_v21 }
  0x66   :  { %1171 = vmatprep.subr.bf16.mxu0 %v1170_v24 }
  0x69   :  { %1173 = vmatpush3.bf16.msra.mxu0 %v1170_v24  ;;  %v1520_v24 = vld [vmem:[#allocation2 + $0x18] sm:$0xff] }
  0x6a   :  { %1207 = vmatprep.subr.bf16.mxu0 %v1206_v44 }
  0x6c   :  { %951 = vmatmul.mubr.f32.vlgmr.msra.gmra.mrb[0].mxu0 %v96_v25  ;;  %v1522_v25 = vld [vmem:[#allocation2 + $0x20] sm:$0xff] }
  0x6d   :  { %953 = vmatprep.mubr.f32.mxu0 %v97_v26  ;;  %1209 = vmatpush3.bf16.msra.mxu0 %v1206_v44  ;;  %v1526_v26 = vld [vmem:[#allocation2 + $0x28] sm:$0xff] }
  0x6e   :  { %1211 = vmatprep.subr.bf16.mxu0 %v1210_v46 }
  0x70   :  { %954 = vmatmul.mubr.f32.gmra.mrb[2].mxu0 %v98_v27  ;;  %v1528_v27 = vld [vmem:[#allocation2 + $0x30] sm:$0xff] }
  0x71   :  { %956 = vmatprep.mubr.f32.mxu0 %v99_v28  ;;  %1213 = vmatpush3.bf16.msra.mxu0 %v1210_v46  ;;  %v1532_v28 = vld [vmem:[#allocation2 + $0x38] sm:$0xff] }
  0x72   :  { %1215 = vmatprep.subr.bf16.mxu0 %v1214_v49 }
  0x74   :  { %957 = vmatmul.mubr.f32.gmra.mrb[4].mxu0 %v100_v29  ;;  %v1534_v29 = vld [vmem:[#allocation2 + $0x40] sm:$0xff] }
  0x75   :  { %959 = vmatprep.mubr.f32.mxu0 %v101_v30  ;;  %1217 = vmatpush3.bf16.msra.mxu0 %v1214_v49  ;;  %v1538_v30 = vld [vmem:[#allocation2 + $0x48] sm:$0xff] }
  0x76   :  { %1219 = vmatprep.subr.bf16.mxu0 %v1218_v52 }
  0x78   :  { %960 = vmatmul.mubr.f32.gmra.mrb[6].mxu0 %v102_v31  ;;  %v1540_v31 = vld [vmem:[#allocation2 + $0x50] sm:$0xff] }
  0x79   :  { %962 = vmatprep.mubr.f32.mxu0 %v103_v32  ;;  %1221 = vmatpush3.bf16.msra.mxu0 %v1218_v52  ;;  %v1544_v32 = vld [vmem:[#allocation2 + $0x58] sm:$0xff] }
  0x7a   :  { %1223 = vmatprep.subr.bf16.mxu0 %v1222_v55 }
  0x7c   :  { %963 = vmatmul.mubr.f32.gmra.mrb[8].mxu0 %v104_v33  ;;  %v1546_v33 = vld [vmem:[#allocation2 + $0x60] sm:$0xff] }
  0x7d   :  { %965 = vmatprep.mubr.f32.mxu0 %v105_v34  ;;  %1225 = vmatpush3.bf16.msra.mxu0 %v1222_v55  ;;  %v1550_v34 = vld [vmem:[#allocation2 + $0x68] sm:$0xff] }
  0x7e   :  { %1227 = vmatprep.subr.bf16.mxu0 %v1226_v58 }
  0x80   :  { %966 = vmatmul.mubr.f32.gmra.mrb[10].mxu0 %v106_v35  ;;  %v1552_v35 = vld [vmem:[#allocation2 + $0x70] sm:$0xff] }
  0x81   :  { %968 = vmatprep.mubr.f32.mxu0 %v107_v36  ;;  %1229 = vmatpush3.bf16.msra.mxu0 %v1226_v58  ;;  %v1556_v36 = vld [vmem:[#allocation2 + $0x78] sm:$0xff] }
  0x82   :  { %1231 = vmatprep.subr.bf16.mxu0 %v1230_v61 }
  0x84   :  { %969 = vmatmul.mubr.f32.gmra.mrb[12].mxu0 %v108_v37  ;;  %v454_v37 = vld [vmem:[#allocation8 + $0x70] sm:$0xff] }
  0x85   :  { %971 = vmatprep.mubr.f32.mxu0 %v109_v38  ;;  %1233 = vmatpush3.bf16.msra.mxu0 %v1230_v61  ;;  %v455_v38 = vld [vmem:[#allocation8 + $0x78] sm:$0xff] }
  0x88   :  { %972 = vmatmul.mubr.f32.gmra.mrb[14].mxu0 %v110_v39  ;;  %v1234_v39 = vpack.c.bf16 %v455_v38, %v454_v37 }
  0x8a   :  { %1235 = vmatprep.subr.bf16.mxu0 %v1234_v39 }
  0x8b   :  { %1237 = vmatpush3.bf16.msra.mxu0 %v1234_v39 }
 0x13f   :  { %v952_v62 = vpop.f32.mrb[0].mxu0 }
 0x140   :  { %v193_v63 = vpop.f32.mrb[1].mxu0 }
 0x141   :  { %v1174_v0 = vpack.c.bf16 %v952_v62, %v193_v63 }
 0x143   :  { %v955_v1 = vpop.f32.mrb[2].mxu0  ;;  %1175 = vmatprep.subr.bf16.mxu1 %v1174_v0 }
 0x144   :  { %v203_v2 = vpop.f32.mrb[3].mxu0  ;;  %1177 = vmatpush3.bf16.msra.mxu1 %v1174_v0 }
 0x145   :  { %v1178_v3 = vpack.c.bf16 %v955_v1, %v203_v2 }
 0x147   :  { %v958_v4 = vpop.f32.mrb[4].mxu0  ;;  %1179 = vmatprep.subr.bf16.mxu1 %v1178_v3 }
 0x148   :  { %v213_v5 = vpop.f32.mrb[5].mxu0  ;;  %1181 = vmatpush3.bf16.msra.mxu1 %v1178_v3 }
 0x149   :  { %v1182_v6 = vpack.c.bf16 %v958_v4, %v213_v5 }
 0x14b   :  { %v961_v7 = vpop.f32.mrb[6].mxu0  ;;  %1183 = vmatprep.subr.bf16.mxu1 %v1182_v6 }
 0x14c   :  { %v223_v8 = vpop.f32.mrb[7].mxu0  ;;  %1185 = vmatpush3.bf16.msra.mxu1 %v1182_v6 }
 0x14d   :  { %v1186_v9 = vpack.c.bf16 %v961_v7, %v223_v8 }
 0x14f   :  { %v964_v10 = vpop.f32.mrb[8].mxu0  ;;  %1187 = vmatprep.subr.bf16.mxu1 %v1186_v9 }
 0x150   :  { %v233_v11 = vpop.f32.mrb[9].mxu0  ;;  %1189 = vmatpush3.bf16.msra.mxu1 %v1186_v9 }
 0x151   :  { %v1190_v12 = vpack.c.bf16 %v964_v10, %v233_v11 }
 0x153   :  { %v967_v13 = vpop.f32.mrb[10].mxu0  ;;  %1191 = vmatprep.subr.bf16.mxu1 %v1190_v12 }
 0x154   :  { %v243_v14 = vpop.f32.mrb[11].mxu0  ;;  %1193 = vmatpush3.bf16.msra.mxu1 %v1190_v12 }
 0x155   :  { %v1194_v15 = vpack.c.bf16 %v967_v13, %v243_v14 }
 0x157   :  { %v970_v16 = vpop.f32.mrb[12].mxu0  ;;  %1195 = vmatprep.subr.bf16.mxu1 %v1194_v15 }
 0x158   :  { %v253_v17 = vpop.f32.mrb[13].mxu0  ;;  %1197 = vmatpush3.bf16.msra.mxu1 %v1194_v15 }
 0x159   :  { %v1198_v18 = vpack.c.bf16 %v970_v16, %v253_v17 }
 0x15b   :  { %v973_v19 = vpop.f32.mrb[14].mxu0  ;;  %1199 = vmatprep.subr.bf16.mxu1 %v1198_v18 }
 0x15c   :  { %v263_v20 = vpop.f32.mrb[15].mxu0  ;;  %1201 = vmatpush3.bf16.msra.mxu1 %v1198_v18 }
 0x15d   :  { %v1202_v21 = vpack.c.bf16 %v973_v19, %v263_v20 }
 0x15f   :  { %1203 = vmatprep.subr.bf16.mxu1 %v1202_v21 }
 0x160   :  { %1205 = vmatpush3.bf16.msra.mxu1 %v1202_v21 }
 0x163   :  { %1007 = vmatmul.mubr.f32.vlgmr.msra.gmra.mrb[0].mxu1 %v1514_v22 }
 0x164   :  { %1009 = vmatprep.mubr.f32.mxu1 %v1516_v23 }
 0x167   :  { %1010 = vmatmul.mubr.f32.gmra.mrb[2].mxu1 %v1520_v24 }
 0x168   :  { %1012 = vmatprep.mubr.f32.mxu1 %v1522_v25 }
 0x16b   :  { %1013 = vmatmul.mubr.f32.gmra.mrb[4].mxu1 %v1526_v26 }
 0x16c   :  { %1015 = vmatprep.mubr.f32.mxu1 %v1528_v27 }
 0x16f   :  { %1016 = vmatmul.mubr.f32.gmra.mrb[6].mxu1 %v1532_v28 }
 0x170   :  { %1018 = vmatprep.mubr.f32.mxu1 %v1534_v29 }
 0x173   :  { %1019 = vmatmul.mubr.f32.gmra.mrb[8].mxu1 %v1538_v30 }
 0x174   :  { %1021 = vmatprep.mubr.f32.mxu1 %v1540_v31 }
 0x177   :  { %1022 = vmatmul.mubr.f32.gmra.mrb[10].mxu1 %v1544_v32 }
 0x178   :  { %1024 = vmatprep.mubr.f32.mxu1 %v1546_v33 }
 0x17b   :  { %1025 = vmatmul.mubr.f32.gmra.mrb[12].mxu1 %v1550_v34 }
 0x17c   :  { %1027 = vmatprep.mubr.f32.mxu1 %v1552_v35 }
 0x17f   :  { %1028 = vmatmul.mubr.f32.gmra.mrb[14].mxu1 %v1556_v36 }
 0x180   :  { %1118 = vmatprep.mubr.f32.mxu1 %v1511_v40 }
 0x236   :  { %v1008_v42 = vpop.f32.mrb[0].mxu1 }
 0x237   :  { %v351_v43 = vadd.f32 %v1008_v42, %v788_v41  ;;  %v345_v44 = vpop.f32.mrb[1].mxu1 }
 0x238   :  { %v346_v45 = vadd.f32 %v788_v41, %v345_v44 }
 0x239   :  { %v425_v48 = vmax.f32 %v351_v43, 0.0 }
 0x23a   :  { %v424_v46 = vmax.f32 %v346_v45, 0.0  ;;  %v1011_v47 = vpop.f32.mrb[2].mxu1 }
 0x23b   :  { %v361_v49 = vadd.f32 %v1011_v47, %v788_v41  ;;  %v355_v50 = vpop.f32.mrb[3].mxu1 }
 0x23c   :  { %v356_v51 = vadd.f32 %v788_v41, %v355_v50  ;;  %1062 = vmatprep.mubr.f32.mxu0 %v424_v46 }
 0x23d   :  { %1063 = vmatmul.mubr.f32.vlgmr.msra.gmra.mrb[16].mxu0 %v425_v48  ;;  %v427_v53 = vmax.f32 %v361_v49, 0.0 }
 0x23e   :  { %v426_v40 = vmax.f32 %v356_v51, 0.0  ;;  %v1014_v52 = vpop.f32.mrb[4].mxu1 }
 0x23f   :  { %v371_v54 = vadd.f32 %v1014_v52, %v788_v41  ;;  %v365_v55 = vpop.f32.mrb[5].mxu1 }
 0x240   :  { %v366_v56 = vadd.f32 %v788_v41, %v365_v55  ;;  %1065 = vmatprep.mubr.f32.mxu0 %v426_v40 }
 0x241   :  { %1066 = vmatmul.mubr.f32.gmra.mrb[18].mxu0 %v427_v53  ;;  %v429_v59 = vmax.f32 %v371_v54, 0.0 }
 0x242   :  { %v428_v57 = vmax.f32 %v366_v56, 0.0  ;;  %v1017_v58 = vpop.f32.mrb[6].mxu1 }
 0x243   :  { %v381_v60 = vadd.f32 %v1017_v58, %v788_v41  ;;  %v375_v61 = vpop.f32.mrb[7].mxu1 }
 0x244   :  { %v376_v62 = vadd.f32 %v788_v41, %v375_v61  ;;  %1068 = vmatprep.mubr.f32.mxu0 %v428_v57 }
 0x245   :  { %1069 = vmatmul.mubr.f32.gmra.mrb[20].mxu0 %v429_v59  ;;  %v431_v1 = vmax.f32 %v381_v60, 0.0 }
 0x246   :  { %v430_v63 = vmax.f32 %v376_v62, 0.0  ;;  %v1020_v0 = vpop.f32.mrb[8].mxu1 }
 0x247   :  { %v391_v2 = vadd.f32 %v1020_v0, %v788_v41  ;;  %v385_v3 = vpop.f32.mrb[9].mxu1 }
 0x248   :  { %v386_v4 = vadd.f32 %v788_v41, %v385_v3  ;;  %1071 = vmatprep.mubr.f32.mxu0 %v430_v63 }
 0x249   :  { %1072 = vmatmul.mubr.f32.gmra.mrb[22].mxu0 %v431_v1  ;;  %v433_v7 = vmax.f32 %v391_v2, 0.0 }
 0x24a   :  { %v432_v5 = vmax.f32 %v386_v4, 0.0  ;;  %v1023_v6 = vpop.f32.mrb[10].mxu1 }
 0x24b   :  { %v401_v8 = vadd.f32 %v1023_v6, %v788_v41  ;;  %v395_v9 = vpop.f32.mrb[11].mxu1 }
 0x24c   :  { %v396_v10 = vadd.f32 %v788_v41, %v395_v9  ;;  %1074 = vmatprep.mubr.f32.mxu0 %v432_v5 }
 0x24d   :  { %1075 = vmatmul.mubr.f32.gmra.mrb[24].mxu0 %v433_v7  ;;  %v435_v13 = vmax.f32 %v401_v8, 0.0 }
 0x24e   :  { %v434_v11 = vmax.f32 %v396_v10, 0.0  ;;  %v1026_v12 = vpop.f32.mrb[12].mxu1 }
 0x24f   :  { %v411_v14 = vadd.f32 %v1026_v12, %v788_v41  ;;  %v405_v15 = vpop.f32.mrb[13].mxu1 }
 0x250   :  { %v406_v16 = vadd.f32 %v788_v41, %v405_v15  ;;  %1077 = vmatprep.mubr.f32.mxu0 %v434_v11 }
 0x251   :  { %1078 = vmatmul.mubr.f32.gmra.mrb[26].mxu0 %v435_v13  ;;  %v437_v19 = vmax.f32 %v411_v14, 0.0 }
 0x252   :  { %v436_v17 = vmax.f32 %v406_v16, 0.0  ;;  %v1029_v18 = vpop.f32.mrb[14].mxu1 }
 0x253   :  { %v421_v20 = vadd.f32 %v1029_v18, %v788_v41  ;;  %v415_v21 = vpop.f32.mrb[15].mxu1 }
 0x254   :  { %v416_v37 = vadd.f32 %v788_v41, %v415_v21  ;;  %1080 = vmatprep.mubr.f32.mxu0 %v436_v17 }
 0x255   :  { %1081 = vmatmul.mubr.f32.gmra.mrb[28].mxu0 %v437_v19  ;;  %v439_v39 = vmax.f32 %v421_v20, 0.0 }
 0x256   :  { %v438_v38 = vmax.f32 %v416_v37, 0.0 }
 0x258   :  { %1083 = vmatprep.mubr.f32.mxu0 %v438_v38 }
 0x259   :  { %1084 = vmatmul.mubr.f32.gmra.mrb[30].mxu0 %v439_v39 }
 0x310   :  { %v1064_v42 = vpop.f32.mrb[16].mxu0 }
 0x311   :  { %v522_v43 = vpop.f32.mrb[17].mxu0 }
 0x312   :  { %v1238_v44 = vpack.c.bf16 %v1064_v42, %v522_v43 }
 0x314   :  { %v1067_v45 = vpop.f32.mrb[18].mxu0  ;;  %1239 = vmatprep.subr.bf16.mxu1 %v1238_v44 }
 0x315   :  { %v532_v46 = vpop.f32.mrb[19].mxu0  ;;  %1241 = vmatpush3.bf16.msra.mxu1 %v1238_v44 }
 0x316   :  { %v1242_v47 = vpack.c.bf16 %v1067_v45, %v532_v46 }
 0x318   :  { %v1070_v48 = vpop.f32.mrb[20].mxu0  ;;  %1243 = vmatprep.subr.bf16.mxu1 %v1242_v47 }
 0x319   :  { %v542_v49 = vpop.f32.mrb[21].mxu0  ;;  %1245 = vmatpush3.bf16.msra.mxu1 %v1242_v47 }
 0x31a   :  { %v1246_v50 = vpack.c.bf16 %v1070_v48, %v542_v49 }
 0x31c   :  { %v1073_v41 = vpop.f32.mrb[22].mxu0  ;;  %1247 = vmatprep.subr.bf16.mxu1 %v1246_v50 }
 0x31d   :  { %v552_v51 = vpop.f32.mrb[23].mxu0  ;;  %1249 = vmatpush3.bf16.msra.mxu1 %v1246_v50 }
 0x31e   :  { %v1250_v40 = vpack.c.bf16 %v1073_v41, %v552_v51 }
 0x320   :  { %v1076_v52 = vpop.f32.mrb[24].mxu0  ;;  %1251 = vmatprep.subr.bf16.mxu1 %v1250_v40 }
 0x321   :  { %v562_v53 = vpop.f32.mrb[25].mxu0  ;;  %1253 = vmatpush3.bf16.msra.mxu1 %v1250_v40 }
 0x322   :  { %v1254_v54 = vpack.c.bf16 %v1076_v52, %v562_v53 }
 0x324   :  { %v1079_v55 = vpop.f32.mrb[26].mxu0  ;;  %1255 = vmatprep.subr.bf16.mxu1 %v1254_v54 }
 0x325   :  { %v572_v56 = vpop.f32.mrb[27].mxu0  ;;  %1257 = vmatpush3.bf16.msra.mxu1 %v1254_v54 }
 0x326   :  { %v1258_v57 = vpack.c.bf16 %v1079_v55, %v572_v56 }
 0x328   :  { %v1082_v58 = vpop.f32.mrb[28].mxu0  ;;  %1259 = vmatprep.subr.bf16.mxu1 %v1258_v57 }
 0x329   :  { %v582_v59 = vpop.f32.mrb[29].mxu0  ;;  %1261 = vmatpush3.bf16.msra.mxu1 %v1258_v57 }
 0x32a   :  { %v1262_v60 = vpack.c.bf16 %v1082_v58, %v582_v59 }
 0x32c   :  { %v1085_v61 = vpop.f32.mrb[30].mxu0  ;;  %1263 = vmatprep.subr.bf16.mxu1 %v1262_v60 }
 0x32d   :  { %v592_v62 = vpop.f32.mrb[31].mxu0  ;;  %1265 = vmatpush3.bf16.msra.mxu1 %v1262_v60 }
 0x32e   :  { %v1266_v63 = vpack.c.bf16 %v1085_v61, %v592_v62 }
 0x330   :  { %1267 = vmatprep.subr.bf16.mxu1 %v1266_v63 }
 0x331   :  { %1269 = vmatpush3.bf16.msra.mxu1 %v1266_v63 }
 0x334   :  { %1119 = vmatmul.mubr.f32.vlgmr.msra.gmra.mrb[16].mxu1 %v1514_v22  ;;  %v789_v22 = vld [vmem:[%s1601_s5] ss:$0 sm:$0xff]  ;;  %s1401_s5 = smov [#allocation10]  }
 0x335   :  { %1121 = vmatprep.mubr.f32.mxu1 %v1516_v23  ;;  %s774_s23 = sshll.u32 %s1401_s5, 4  ;;  %s775_s23 = int_to_ptr.vmem [resolvable:$true] %s774_s23 }
 0x336   :  { %s1365_s25 = scalar_lea.vmem %s775_s23, 2048  ;;  %p1370_p5 = scmp.lt.s32.totalorder %s775_s23, %s775_s23 }
 0x337   :  { %p1366_p4 = scmp.ne.s32.totalorder %s775_s23, %s1365_s25  ;;  %p1371_p6 = scmp.lt.s32.totalorder %s1365_s25, %s1365_s25 }
 0x338   :  { %1122 = vmatmul.mubr.f32.gmra.mrb[18].mxu1 %v1520_v24 }
 0x339   :  { %1124 = vmatprep.mubr.f32.mxu1 %v1522_v25  ;;  %p1372_p7 = por %p1371_p6, %p1370_p5 }
 0x33b   :  { %p1373_p8 = pnand %p1372_p7, %p1366_p4 }
 0x33c   :  { %1125 = vmatmul.mubr.f32.gmra.mrb[20].mxu1 %v1526_v26 }
 0x33d   :  { %1127 = vmatprep.mubr.f32.mxu1 %v1528_v27 }
 0x340   :  { %1128 = vmatmul.mubr.f32.gmra.mrb[22].mxu1 %v1532_v28 }
 0x341   :  { %1130 = vmatprep.mubr.f32.mxu1 %v1534_v29 }
 0x344   :  { %1131 = vmatmul.mubr.f32.gmra.mrb[24].mxu1 %v1538_v30 }
 0x345   :  { %1133 = vmatprep.mubr.f32.mxu1 %v1540_v31 }
 0x348   :  { %1134 = vmatmul.mubr.f32.gmra.mrb[26].mxu1 %v1544_v32 }
 0x349   :  { %1136 = vmatprep.mubr.f32.mxu1 %v1546_v33 }
 0x34c   :  { %1137 = vmatmul.mubr.f32.gmra.mrb[28].mxu1 %v1550_v34 }
 0x34d   :  { %1139 = vmatprep.mubr.f32.mxu1 %v1552_v35 }
 0x350   :  { %1140 = vmatmul.mubr.f32.gmra.mrb[30].mxu1 %v1556_v36 }
 0x407   :  { %v1120_v23 = vpop.f32.mrb[16].mxu1 }
 0x408   :  { %v680_v24 = vadd.f32 %v1120_v23, %v789_v22  ;;  %v674_v25 = vpop.f32.mrb[17].mxu1 }
 0x409   :  { %v675_v26 = vadd.f32 %v789_v22, %v674_v25 }
 0x40a   :  { %754 = vst [vmem:[#allocation10 + $0x8] sm:$0xff] %v680_v24 }
 0x40b   :  { %753 = vst [vmem:[#allocation10] sm:$0xff] %v675_v26  ;;  %v1123_v27 = vpop.f32.mrb[18].mxu1 }
 0x40c   :  { %v690_v28 = vadd.f32 %v1123_v27, %v789_v22  ;;  %v684_v29 = vpop.f32.mrb[19].mxu1 }
 0x40d   :  { %v685_v30 = vadd.f32 %v789_v22, %v684_v29 }
 0x40e   :  { %756 = vst [vmem:[#allocation10 + $0x18] sm:$0xff] %v690_v28 }
 0x40f   :  { %755 = vst [vmem:[#allocation10 + $0x10] sm:$0xff] %v685_v30  ;;  %v1126_v31 = vpop.f32.mrb[20].mxu1 }
 0x410   :  { %v700_v32 = vadd.f32 %v1126_v31, %v789_v22  ;;  %v694_v33 = vpop.f32.mrb[21].mxu1 }
 0x411   :  { %v695_v34 = vadd.f32 %v789_v22, %v694_v33 }
 0x412   :  { %758 = vst [vmem:[#allocation10 + $0x28] sm:$0xff] %v700_v32 }
 0x413   :  { %757 = vst [vmem:[#allocation10 + $0x20] sm:$0xff] %v695_v34  ;;  %v1129_v35 = vpop.f32.mrb[22].mxu1 }
 0x414   :  { %v710_v36 = vadd.f32 %v1129_v35, %v789_v22  ;;  %v704_v0 = vpop.f32.mrb[23].mxu1 }
 0x415   :  { %v705_v1 = vadd.f32 %v789_v22, %v704_v0 }
 0x416   :  { %760 = vst [vmem:[#allocation10 + $0x38] sm:$0xff] %v710_v36 }
 0x417   :  { %759 = vst [vmem:[#allocation10 + $0x30] sm:$0xff] %v705_v1  ;;  %v1132_v2 = vpop.f32.mrb[24].mxu1 }
 0x418   :  { %v720_v3 = vadd.f32 %v1132_v2, %v789_v22  ;;  %v714_v4 = vpop.f32.mrb[25].mxu1 }
 0x419   :  { %v715_v5 = vadd.f32 %v789_v22, %v714_v4 }
 0x41a   :  { %762 = vst [vmem:[#allocation10 + $0x48] sm:$0xff] %v720_v3 }
 0x41b   :  { %761 = vst [vmem:[#allocation10 + $0x40] sm:$0xff] %v715_v5  ;;  %v1135_v6 = vpop.f32.mrb[26].mxu1 }
 0x41c   :  { %v730_v7 = vadd.f32 %v1135_v6, %v789_v22  ;;  %v724_v8 = vpop.f32.mrb[27].mxu1 }
 0x41d   :  { %v725_v9 = vadd.f32 %v789_v22, %v724_v8 }
 0x41e   :  { %764 = vst [vmem:[#allocation10 + $0x58] sm:$0xff] %v730_v7 }
 0x41f   :  { %763 = vst [vmem:[#allocation10 + $0x50] sm:$0xff] %v725_v9  ;;  %v1138_v10 = vpop.f32.mrb[28].mxu1 }
 0x420   :  { %v740_v11 = vadd.f32 %v1138_v10, %v789_v22  ;;  %v734_v12 = vpop.f32.mrb[29].mxu1 }
 0x421   :  { %v735_v13 = vadd.f32 %v789_v22, %v734_v12 }
 0x422   :  { %766 = vst [vmem:[#allocation10 + $0x68] sm:$0xff] %v740_v11 }
 0x423   :  { %765 = vst [vmem:[#allocation10 + $0x60] sm:$0xff] %v735_v13  ;;  %v1141_v14 = vpop.f32.mrb[30].mxu1 }
 0x424   :  { %v750_v15 = vadd.f32 %v1141_v14, %v789_v22  ;;  %v744_v16 = vpop.f32.mrb[31].mxu1 }
 0x425   :  { %v745_v17 = vadd.f32 %v789_v22, %v744_v16 }
 0x426   :  { %768 = vst [vmem:[#allocation10 + $0x78] sm:$0xff] %v750_v15 }
 0x427   :  { %767 = vst [vmem:[#allocation10 + $0x70] sm:$0xff] %v745_v17 }
 0x428   :  { %1376 = shalt.err (!%p1373_p8)
}
 0x429   :  { %s1377_s28 = scalar_lea.hbm %s1602_s6, 2048 }
 0x42a   :  { %p1378_p9 = scmp.ne.s32.totalorder %s1602_s6, %s1377_s28  ;;  %p1381_p10 = scmp.lt.u32.totalorder %s1377_s28, %s1602_s6 }
 0x42c   :  { %p1383_p11 = pnand %p1381_p10, %p1378_p9 }
 0x42e   :  { %1386 = shalt.err (!%p1383_p11)
}
 0x42f   :  { %780 = dma.vmem_to_hbm [thread:$0]  %s775_s23, 2048, %s1602_s6, [#allocation4], %s1397_s9, %s1397_s9, %s1398_s10  }
 0x430   :  { %1393 = dma.done.wait [#allocation4], 2048  }
 0x431   :  { %1394 = vsyncadd [#allocation4], 4294965248 }
 0x432   :  { %784 = vsyncpa [#allocation3], 1 }
 0x433   :  { %785 = vsyncpa [#allocation6], 1 }
 0x434   :  { %786 = vsyncpa [#allocation9], 1 }
 0x435   :  { %787 = vsyncpa [#allocation4], 1 }

</bundles_post_ra>
